<compile_context>
chip_gen: v7x
topology: tpu7x:2x2x1
jax: 0.10.0
libtpu: 0.0.40
codegen_flags: <defaults>
</compile_context>

<pallas_src>
import functools

import jax
import jax.numpy as jnp
from jax.experimental import pallas as pl
from jax.experimental.pallas import tpu as pltpu

_LANES = 128
_SUBLANES = 8
_MAX_BLOCK_ROWS = 1024  # (1024, 128) f32 = 512 KiB per pipeline buffer.


def _round_up(a, b):
    return ((a + b - 1) // b) * b


def _cdiv(a, b):
    return (a + b - 1) // b


def _l1_kernel(x_ref, y_ref, acc_ref, *, inner_blocks, block_rows, total_rows,
               needs_mask):
    i = pl.program_id(1)

    @pl.when(i == 0)
    def _():
        acc_ref[...] = jnp.zeros_like(acc_ref)

    # Cast inside the kernel (inputs stay in their HBM dtype).
    d = jnp.abs(x_ref[...].astype(jnp.float32) - y_ref[...].astype(jnp.float32))

    if needs_mask:
        # Logical (unclamped) block index -> zero rows beyond the real data
        # (covers both partial tail blocks and duplicated clamped blocks).
        blk = pl.program_id(0) * inner_blocks + i
        row0 = blk * block_rows
        local_rows = jax.lax.broadcasted_iota(
            jnp.int32, (block_rows, _LANES), 0)
        valid = (row0 + local_rows) < total_rows
        d = jnp.where(valid, d, jnp.float32(0.0))

    # Per-lane partial sums: pure VPU adds into the resident (8, 128)
    # accumulator block (no per-step cross-lane reduce).
    partial = d.reshape(block_rows // _SUBLANES, _SUBLANES, _LANES).sum(axis=0)
    acc_ref[...] += partial[None, :, :]


def l1_loss(x, y):
    """Mean of |x - y|, matching torch.nn.L1Loss() (reduction='mean')."""
    assert x.shape == y.shape, "L1Loss expects same-shaped inputs"
    n = x.size

    xf = x.reshape(-1)
    yf = y.reshape(-1)
    # Only pad when n is not a lane multiple (zero pad contributes 0 to |x-y|).
    if n % _LANES != 0:
        pad = _LANES - (n % _LANES)
        xf = jnp.pad(xf, (0, pad))
        yf = jnp.pad(yf, (0, pad))
    rows = xf.shape[0] // _LANES
    x2 = xf.reshape(rows, _LANES)
    y2 = yf.reshape(rows, _LANES)

    block_rows = min(_MAX_BLOCK_ROWS, _round_up(rows, _SUBLANES))
    num_blocks = _cdiv(rows, block_rows)

    # Split the reduction across 2 TensorCores when there is enough work
    # (megacore win on v7x, harmless sequential no-op on v5e/v6e).
    n_outer = 2 if num_blocks >= 2 else 1
    inner_blocks = _cdiv(num_blocks, n_outer)

    # Mask only needed if some (logical) block reaches past the real rows.
    needs_mask = (n_outer * inner_blocks * block_rows) != rows

    if needs_mask:
        def in_map(c, i):
            # Clamp so the DMA always targets an in-bounds block; out-of-range
            # logical blocks are zeroed by the in-kernel mask.
            return (jnp.minimum(c * inner_blocks + i, num_blocks - 1), 0)
    else:
        def in_map(c, i):
            return (c * inner_blocks + i, 0)

    kernel = functools.partial(
        _l1_kernel,
        inner_blocks=inner_blocks,
        block_rows=block_rows,
        total_rows=rows,
        needs_mask=needs_mask,
    )

    out = pl.pallas_call(
        kernel,
        out_shape=jax.ShapeDtypeStruct((n_outer, _SUBLANES, _LANES),
                                       jnp.float32),
        grid_spec=pltpu.PrefetchScalarGridSpec(
            num_scalar_prefetch=0,
            grid=(n_outer, inner_blocks),
            in_specs=[
                pl.BlockSpec((block_rows, _LANES), in_map),
                pl.BlockSpec((block_rows, _LANES), in_map),
            ],
            out_specs=pl.BlockSpec((1, _SUBLANES, _LANES),
                                   lambda c, i: (c, 0, 0)),
        ),
        compiler_params=pltpu.CompilerParams(
            dimension_semantics=("parallel", "arbitrary"),
        ),
    )(x2, y2)

    # Final tiny reduction + mean in the wrapper (true element count n).
    loss = jnp.sum(out) / n
    return loss.astype(x.dtype)


if __name__ == "__main__":
    key = jax.random.PRNGKey(0)
    kx, ky = jax.random.split(key)

    # Small NCHW-like inputs consistent with an image loss.
    x = jax.random.normal(kx, (2, 4, 16, 16), dtype=jnp.float32)
    y = jax.random.normal(ky, (2, 4, 16, 16), dtype=jnp.float32)

    loss = l1_loss(x, y)
    jax.block_until_ready(loss)
    ref = jnp.mean(jnp.abs(x - y))
    assert jnp.allclose(loss, ref, atol=1e-6, rtol=1e-6), (loss, ref)

    # Also exercise the non-lane-multiple / masked tail path.
    kx2, ky2 = jax.random.split(ky)
    x_odd = jax.random.normal(kx2, (3, 5, 7), dtype=jnp.float32)
    y_odd = jax.random.normal(ky2, (3, 5, 7), dtype=jnp.float32)
    loss_odd = l1_loss(x_odd, y_odd)
    jax.block_until_ready(loss_odd)
    ref_odd = jnp.mean(jnp.abs(x_odd - y_odd))
    assert jnp.allclose(loss_odd, ref_odd, atol=1e-6, rtol=1e-6), (
        loss_odd, ref_odd)

    print("KERNEL_OK")
</pallas_src>

<mosaic_0001>
module attributes {stable_mosaic.version = 11 : i64} {
  func.func @_l1_kernel(%arg0: i32, %arg1: i32, %arg2: memref<16x128xf32, #tpu.memory_space<vmem>>, %arg3: memref<16x128xf32, #tpu.memory_space<vmem>>, %arg4: memref<1x8x128xf32, #tpu.memory_space<vmem>>) attributes {dimension_semantics = [#tpu.dimension_semantics<parallel>, #tpu.dimension_semantics<arbitrary>], iteration_bounds = array<i64: 1, 1>, scalar_prefetch = 0 : i64, scratch_operands = 0 : i64, tpu.core_type = #tpu.core_type<tc>, window_params = [{transform_indices = @transform_0, window_bounds = array<i64: 16, 128>}, {transform_indices = @transform_1, window_bounds = array<i64: 16, 128>}, {transform_indices = @transform_2, window_bounds = array<i64: 1, 8, 128>}]} {
    %c0_i32 = arith.constant 0 : i32
    %0 = arith.cmpi eq, %arg1, %c0_i32 : i32
    %1 = arith.extui %0 : i1 to i32
    %c0_i32_0 = arith.constant 0 : i32
    %2 = arith.cmpi ne, %1, %c0_i32_0 : i32
    scf.if %2 {
      %cst_10 = arith.constant 0.000000e+00 : f32
      %13 = vector.broadcast %cst_10 : f32 to vector<1x8x128xf32>
      %c0_11 = arith.constant 0 : index
      %c0_12 = arith.constant 0 : index
      %c0_13 = arith.constant 0 : index
      %14 = vector.load %arg4[%c0_11, %c0_12, %c0_13] : memref<1x8x128xf32, #tpu.memory_space<vmem>>, vector<1x8x128xf32>
      tpu.vector_store %arg4[%c0_11, %c0_12, %c0_13], %13 {strides = array<i32>} : memref<1x8x128xf32, #tpu.memory_space<vmem>>, vector<1x8x128xf32>,
    } else {
    }
    %c0 = arith.constant 0 : index
    %c0_1 = arith.constant 0 : index
    %3 = vector.load %arg2[%c0, %c0_1] : memref<16x128xf32, #tpu.memory_space<vmem>>, vector<16x128xf32>
    %c0_2 = arith.constant 0 : index
    %c0_3 = arith.constant 0 : index
    %4 = vector.load %arg3[%c0_2, %c0_3] : memref<16x128xf32, #tpu.memory_space<vmem>>, vector<16x128xf32>
    %5 = arith.subf %3, %4 : vector<16x128xf32>
    %6 = math.absf %5 : vector<16x128xf32>
    %7 = vector.shape_cast %6 : vector<16x128xf32> to vector<2x8x128xf32>
    %cst = arith.constant dense<0.000000e+00> : vector<8x128xf32>
    %8 = vector.multi_reduction <add>, %7, %cst [0] : vector<2x8x128xf32> to vector<8x128xf32>
    %c0_4 = arith.constant 0 : index
    %c0_5 = arith.constant 0 : index
    %c0_6 = arith.constant 0 : index
    %9 = vector.load %arg4[%c0_4, %c0_5, %c0_6] : memref<1x8x128xf32, #tpu.memory_space<vmem>>, vector<1x8x128xf32>
    %10 = vector.shape_cast %8 : vector<8x128xf32> to vector<1x8x128xf32>
    %11 = arith.addf %9, %10 : vector<1x8x128xf32>
    %c0_7 = arith.constant 0 : index
    %c0_8 = arith.constant 0 : index
    %c0_9 = arith.constant 0 : index
    %12 = vector.load %arg4[%c0_7, %c0_8, %c0_9] : memref<1x8x128xf32, #tpu.memory_space<vmem>>, vector<1x8x128xf32>
    tpu.vector_store %arg4[%c0_7, %c0_8, %c0_9], %11 {strides = array<i32>} : memref<1x8x128xf32, #tpu.memory_space<vmem>>, vector<1x8x128xf32>,
    return
  }
  func.func @transform_0(%arg0: i32, %arg1: i32) -> (i32, i32) {
    %c1_i32 = arith.constant 1 : i32
    %0 = arith.muli %arg0, %c1_i32 : i32
    %1 = arith.addi %0, %arg1 : i32
    %c0_i32 = arith.constant 0 : i32
    %c0_i32_0 = arith.constant 0 : i32
    return %1, %c0_i32 : i32, i32
  }
  func.func @transform_1(%arg0: i32, %arg1: i32) -> (i32, i32) {
    %c1_i32 = arith.constant 1 : i32
    %0 = arith.muli %arg0, %c1_i32 : i32
    %1 = arith.addi %0, %arg1 : i32
    %c0_i32 = arith.constant 0 : i32
    %c0_i32_0 = arith.constant 0 : i32
    return %1, %c0_i32 : i32, i32
  }
  func.func @transform_2(%arg0: i32, %arg1: i32) -> (i32, i32, i32) {
    %c0_i32 = arith.constant 0 : i32
    %c0_i32_0 = arith.constant 0 : i32
    %c0_i32_1 = arith.constant 0 : i32
    return %arg0, %c0_i32, %c0_i32_0 : i32, i32, i32
  }
}

</mosaic_0001>

<bundles_post_ra>
// kernel: tpu_custom_call.1
= control target key start
LH: loop header
LB: loop body
LE: loop exit
PB: predicated region body
PF: predicated region fallthrough
CT: control target
= control target key end

     0   :  { %7 = vsyncpa [#allocation3], 0  ;;  %s219_s0 = inlined_call_operand.hbm [shape: f32[16,128], index: 0, kind: input, shape index: {}]   ;;  %s220_s1 = inlined_call_operand.hbm [shape: f32[16,128], index: 1, kind: input, shape index: {}]   ;;  %s221_s2 = inlined_call_operand.hbm [shape: f32[1,8,128], index: 2, kind: output, shape index: {}]  }
   0x1   :  { %8 = vsyncpa [#allocation6], 0 }
   0x2   :  { %9 = vsyncpa [#allocation4], 0  ;;  %s163_s9 = smov [#allocation2]   ;;  %s91_s13 = scalar_lea.hbm %s219_s0, 256 }
   0x3   :  { %s19_s10 = sshll.u32 %s163_s9, 4  ;;  %p92_p0 = scmp.ne.s32.totalorder %s219_s0, %s91_s13  ;;  %s20_s10 = int_to_ptr.vmem [resolvable:$true] %s19_s10 }
   0x4   :  { %p95_p1 = scmp.lt.u32.totalorder %s91_s13, %s219_s0 }
   0x6   :  { %p97_p2 = pnand %p95_p1, %p92_p0 }
   0x8   :  { %100 = shalt.err (!%p97_p2)
}
   0x9   :  { %s101_s18 = scalar_lea.vmem %s20_s10, 256  ;;  %p106_p4 = scmp.lt.s32.totalorder %s20_s10, %s20_s10 }
   0xa   :  { %p102_p3 = scmp.ne.s32.totalorder %s20_s10, %s101_s18  ;;  %p107_p5 = scmp.lt.s32.totalorder %s101_s18, %s101_s18 }
   0xc   :  { %p108_p6 = por %p107_p5, %p106_p4 }
   0xe   :  { %p109_p7 = pnand %p108_p6, %p102_p3 }
  0x10   :  { %112 = shalt.err (!%p109_p7)
}
  0x11   :  { %s164_s19 = smov 128   ;;  %s165_s20 = smov 8  }
  0x12   :  { %25 = dma.hbm_to_vmem [thread:$0]  %s219_s0, 256, %s20_s10, [#allocation3], %s164_s19, %s164_s19, %s165_s20  }
  0x13   :  { %s166_s23 = smov [#allocation5]   ;;  %s113_s27 = scalar_lea.hbm %s220_s1, 256 }
  0x14   :  { %s35_s24 = sshll.u32 %s166_s23, 4  ;;  %p114_p8 = scmp.ne.s32.totalorder %s220_s1, %s113_s27  ;;  %s36_s24 = int_to_ptr.vmem [resolvable:$true] %s35_s24 }
  0x15   :  { %p117_p9 = scmp.lt.u32.totalorder %s113_s27, %s220_s1 }
  0x17   :  { %p119_p10 = pnand %p117_p9, %p114_p8 }
  0x19   :  { %122 = shalt.err (!%p119_p10)
}
  0x1a   :  { %s123_s4 = scalar_lea.vmem %s36_s24, 256  ;;  %p128_p12 = scmp.lt.s32.totalorder %s36_s24, %s36_s24 }
  0x1b   :  { %p124_p11 = scmp.ne.s32.totalorder %s36_s24, %s123_s4  ;;  %p129_p13 = scmp.lt.s32.totalorder %s123_s4, %s123_s4 }
  0x1d   :  { %p130_p0 = por %p129_p13, %p128_p12 }
  0x1f   :  { %p131_p1 = pnand %p130_p0, %p124_p11 }
  0x21   :  { %134 = shalt.err (!%p131_p1)
}
  0x22   :  { %41 = dma.hbm_to_vmem [thread:$0]  %s220_s1, 256, %s36_s24, [#allocation6], %s164_s19, %s164_s19, %s165_s20  }
  0x23   :  { %157 = dma.done.wait [#allocation3], 256  }
  0x24   :  { %158 = vsyncadd [#allocation3], 4294967040 }
  0x25   :  { %159 = dma.done.wait [#allocation6], 256  }
  0x26   :  { %160 = vsyncadd [#allocation6], 4294967040  ;;  %v57_v0 = vld [vmem:[#allocation2] sm:$0xff]  ;;  %v58_v1 = vld [vmem:[#allocation2 + $0x8] sm:$0xff]  ;;  %s167_s6 = smov [#allocation7]  }
  0x27   :  { %v59_v2 = vld [vmem:[#allocation5] sm:$0xff]  ;;  %v60_v3 = vld [vmem:[#allocation5 + $0x8] sm:$0xff]  ;;  %s75_s7 = sshll.u32 %s167_s6, 4  ;;  %s76_s7 = int_to_ptr.vmem [resolvable:$true] %s75_s7 }
  0x28   :  { %v61_v4 = vsub.f32 %v57_v0, %v59_v2  ;;  %v62_v5 = vsub.f32 %v58_v1, %v60_v3  ;;  %s135_s8 = scalar_lea.vmem %s76_s7, 128  ;;  %p140_p3 = scmp.lt.s32.totalorder %s76_s7, %s76_s7 }
  0x29   :  { %p136_p2 = scmp.ne.s32.totalorder %s76_s7, %s135_s8  ;;  %p141_p4 = scmp.lt.s32.totalorder %s135_s8, %s135_s8 }
  0x2a   :  { %v63_v6 = vand.u32 2147483647, %v61_v4  ;;  %v64_v7 = vand.u32 2147483647, %v62_v5 }
  0x2b   :  { %p142_p5 = por %p141_p4, %p140_p3 }
  0x2c   :  { %v65_v8 = vadd.f32 %v64_v7, %v63_v6 }
  0x2d   :  { %p143_p6 = pnand %p142_p5, %p136_p2 }
  0x2e   :  { %68 = vst [vmem:[#allocation7] sm:$0xff] %v65_v8 }
  0x2f   :  { %146 = shalt.err (!%p143_p6)
}
  0x30   :  { %s147_s10 = scalar_lea.hbm %s221_s2, 128 }
  0x31   :  { %p148_p7 = scmp.ne.s32.totalorder %s221_s2, %s147_s10  ;;  %p151_p8 = scmp.lt.u32.totalorder %s147_s10, %s221_s2 }
  0x33   :  { %p153_p9 = pnand %p151_p8, %p148_p7 }
  0x35   :  { %156 = shalt.err (!%p153_p9)
}
  0x36   :  { %78 = dma.vmem_to_hbm [thread:$0]  %s76_s7, 128, %s221_s2, [#allocation4]  }
  0x37   :  { %161 = dma.done.wait [#allocation4], 128  }
  0x38   :  { %162 = vsyncadd [#allocation4], 4294967168 }
  0x39   :  { %82 = vsyncpa [#allocation3], 1 }
  0x3a   :  { %83 = vsyncpa [#allocation6], 1 }
  0x3b   :  { %84 = vsyncpa [#allocation4], 1 }

</bundles_post_ra>
